<compile_context>
chip_gen: v6e
topology: v6e:2x2x1
jax: 0.10.0
libtpu: 0.0.40
codegen_flags: <defaults>
</compile_context>

<pallas_src>
import functools
import numpy as np
import jax
import jax.numpy as jnp
from jax.experimental import pallas as pl
from jax.experimental.pallas import tpu as pltpu


# ---------------------------------------------------------------------------
# Kernel 1: params -> rho  (Cholesky-style map, trace normalization)
# ---------------------------------------------------------------------------
def _rho_kernel(tm_ref, tt_ref, rho_re_ref, rho_im_ref, *, chol_h):
    d = tm_ref.shape[0]
    tm = tm_ref[...]          # T_m     (d, d) f32
    tt = tt_ref[...]          # T_m^T   (d, d) f32 (precomputed in glue)

    row = jax.lax.broadcasted_iota(jnp.int32, (d, d), 0)
    col = jax.lax.broadcasted_iota(jnp.int32, (d, d), 1)
    zero = jnp.zeros((d, d), jnp.float32)

    if chol_h:
        # T is Hermitian: Re(T) symmetric, Im(T) antisymmetric ->
        # (Re T)^T == Re T, (Im T)^T == -Im T  (saves 4 mask/select ops).
        t_re = jnp.where(row >= col, tm, tt)
        t_im = jnp.where(row > col, tt, jnp.where(row < col, -tm, zero))
        t_re_t = t_re
        t_im_t = -t_im
    else:
        # T = tril(T_m) + 1j * triu(T_m, 1).T   (strictly lower-triangular imag)
        t_re = jnp.where(row >= col, tm, zero)
        t_im = jnp.where(row > col, tt, zero)
        t_re_t = jnp.where(row <= col, tt, zero)   # (Re T)^T
        t_im_t = jnp.where(row < col, tm, zero)    # (Im T)^T

    # trace(T^H T) = ||T||_F^2 -> no masked-diagonal reduce, no dependence on the
    # matmul results (the division overlaps with the MXU work).
    inv_tr = 1.0 / jnp.sum(t_re * t_re + t_im * t_im)

    # T^H @ T as 4 real MXU matmuls.
    ttemp_re = (jnp.dot(t_re_t, t_re, preferred_element_type=jnp.float32)
                + jnp.dot(t_im_t, t_im, preferred_element_type=jnp.float32))
    ttemp_im = (jnp.dot(t_re_t, t_im, preferred_element_type=jnp.float32)
                - jnp.dot(t_im_t, t_re, preferred_element_type=jnp.float32))

    rho_re_ref[...] = ttemp_re * inv_tr
    rho_im_ref[...] = ttemp_im * inv_tr


# ---------------------------------------------------------------------------
# Kernel 2: streaming measurement contraction  P = rho_tri_vec @ ops_packed
# ---------------------------------------------------------------------------
def _measure_kernel(rho_ref, ops_ref, out_ref):
    # (1, d*d) @ (d*d, TP) -> lane-dense (1, TP) tile on the MXU.
    out_ref[...] = jnp.dot(rho_ref[...], ops_ref[...],
                           preferred_element_type=jnp.float32)


# ---------------------------------------------------------------------------
# Wrapper
# ---------------------------------------------------------------------------
def _choose_tile(d, n_p, itemsize):
    """Pick the n_P tile (multiple of 128) and padded n_P.

    Budget ~8 MiB per operator buffer (x2 for double buffering) so tiles stay
    well inside the 64 MiB VMEM of v7x (and the 128 MiB of v5e/v6e)."""
    col_bytes = d * d * itemsize                   # one packed operator column
    n_p128 = ((n_p + 127) // 128) * 128
    budget = 8 * 1024 * 1024
    tp = (budget // col_bytes) // 128 * 128
    tp = max(128, min(4096, tp, n_p128))
    n_pad = ((n_p128 + tp - 1) // tp) * tp
    return tp, n_pad


def _pack_operators(ops_sel, d, n_pad, ops_dtype, tri):
    """Pack operators for the Hermitian-rho contraction (contraction dim leading).

    row r < d(d+1)/2 : A_p[ij] = Re(Op_p[i,j]) + Re(Op_p[j,i])  (i<j),
                                  Re(Op_p[i,i])                  (i==j)
    remaining rows   : B_p[ij] = Im(Op_p[i,j]) - Im(Op_p[j,i])  (i<j)
    Columns zero-padded to n_pad (multiple of the tile and of 128).
    Exact for any complex Op because rho is Hermitian; halves HBM traffic
    versus a full real+imag packing.  (Constant across training steps, so in a
    training loop this packing can be hoisted / cached.)"""
    (iu_r, ju_r), (iu_s, ju_s) = tri
    n_p = ops_sel.shape[0]
    ops_re = jnp.real(ops_sel)                                  # (n_p, d, d)
    ops_im = jnp.imag(ops_sel)
    a = ops_re[:, ju_r, iu_r] + ops_re[:, iu_r, ju_r]           # (n_p, d(d+1)/2)
    diag = np.asarray(iu_r == ju_r)
    a = jnp.where(diag[None, :], ops_re[:, iu_r, ju_r], a)      # fix i==j rows
    b = ops_im[:, iu_s, ju_s] - ops_im[:, ju_s, iu_s]           # (n_p, d(d-1)/2)
    packed = jnp.concatenate([a, b], axis=1).T                  # (d*d, n_p)
    packed = jnp.pad(packed, ((0, 0), (0, n_pad - n_p)))
    return packed.astype(ops_dtype)


def snn_forward(params, ops_sel, *, n_qubits, map_method="chol_h",
                ops_dtype=jnp.float32):
    """Pallas implementation of SNN_nn.forward() for 'chol' / 'chol_h' mappings.

    ops_dtype=jnp.bfloat16 halves HBM traffic of the (memory-bound) measurement
    stream further but may not meet tight tolerances; default keeps f32."""
    assert map_method in ("chol", "chol_h")
    d = 2 ** n_qubits
    n_p = ops_sel.shape[0]
    itemsize = jnp.dtype(ops_dtype).itemsize
    tp, n_pad = _choose_tile(d, n_p, itemsize)
    tri = (np.triu_indices(d), np.triu_indices(d, 1))           # static indices

    # ---- kernel 1: rho from params (single tiny block) ----
    t_m = params.reshape(d, d).astype(jnp.float32)
    rho_re, rho_im = pl.pallas_call(
        functools.partial(_rho_kernel, chol_h=(map_method == "chol_h")),
        out_shape=(jax.ShapeDtypeStruct((d, d), jnp.float32),
                   jax.ShapeDtypeStruct((d, d), jnp.float32)),
    )(t_m, t_m.T)

    # Triangle-pack rho (upper Re, strict-upper Im) in glue: tiny gather, XLA-fused.
    (iu_r, ju_r), (iu_s, ju_s) = tri
    rho_vec = jnp.concatenate([rho_re[iu_r, ju_r], rho_im[iu_s, ju_s]])
    rho_vec = rho_vec[None, :].astype(ops_dtype)                # (1, d*d)

    # ---- kernel 2: streamed, tiled, lane-dense measurement contraction ----
    ops_packed = _pack_operators(ops_sel, d, n_pad, ops_dtype, tri)  # (d*d, n_pad)

    k = d * d
    ops_block_bytes = k * tp * itemsize
    vmem_limit = int(min(max(2 * ops_block_bytes + (4 << 20), 16 << 20), 48 << 20))

    out = pl.pallas_call(
        _measure_kernel,
        out_shape=jax.ShapeDtypeStruct((1, n_pad), jnp.float32),
        grid=(n_pad // tp,),
        in_specs=[
            pl.BlockSpec((1, k), lambda i: (0, 0)),       # rho: tiny, resident
            pl.BlockSpec((k, tp), lambda i: (0, i)),      # operators: streamed
        ],
        out_specs=pl.BlockSpec((1, tp), lambda i: (0, i)),  # lane-dense output
        compiler_params=pltpu.CompilerParams(
            dimension_semantics=("parallel",),
            vmem_limit_bytes=vmem_limit,
        ),
        cost_estimate=pl.CostEstimate(
            flops=2 * k * n_pad,
            transcendentals=0,
            bytes_accessed=k * n_pad * itemsize + k * itemsize + n_pad * 4,
        ),
    )(rho_vec, ops_packed)

    return out[0, :n_p]


# ---------------------------------------------------------------------------
# Glue: POVM construction, operator kron products, pure-JAX reference
# ---------------------------------------------------------------------------
def tetra_povm():
    """Tetrahedral 4-outcome single-qubit POVM: M_k = 1/4 (I + s_k . sigma)."""
    s = np.array([[1, 1, 1], [1, -1, -1], [-1, 1, -1], [-1, -1, 1]],
                 dtype=np.float64) / np.sqrt(3.0)
    I = np.eye(2, dtype=np.complex128)
    sx = np.array([[0, 1], [1, 0]], dtype=np.complex128)
    sy = np.array([[0, -1j], [1j, 0]], dtype=np.complex128)
    sz = np.array([[1, 0], [0, -1]], dtype=np.complex128)
    M = np.stack([0.25 * (I + s[k, 0] * sx + s[k, 1] * sy + s[k, 2] * sz)
                  for k in range(4)])
    return M  # (4, 2, 2) complex


def build_operators(M, n_qubits):
    """All K^N tensor-product POVM operators (first qubit index most significant)."""
    K = M.shape[0]
    out = []
    for p in range(K ** n_qubits):
        digits = []
        rem = p
        for _ in range(n_qubits):
            digits.append(rem % K)
            rem //= K
        digits = digits[::-1]
        op = np.array([[1.0 + 0.0j]])
        for k in digits:
            op = np.kron(op, M[k])
        out.append(op)
    return np.stack(out)  # (K^N, 2^N, 2^N) complex


def reference_forward(params, ops_sel, n_qubits, map_method="chol_h"):
    """Pure-JAX complex reference reproducing the PyTorch semantics."""
    d = 2 ** n_qubits
    T_m = params.reshape(d, d)
    T = jnp.tril(T_m) + 1j * jnp.triu(T_m, 1).T
    if map_method == "chol_h":
        T = T + jnp.tril(T, -1).conj().T
    TT = T.conj().T @ T
    rho = TT / jnp.trace(TT)
    P = jnp.real(jnp.einsum("pij,ji->p", ops_sel, rho))
    return P.astype(jnp.float32)


if __name__ == "__main__":
    n_qubits = 3            # small: d = 8, 4^N = 64 parameters
    K = 4
    d = 2 ** n_qubits

    key = jax.random.PRNGKey(0)
    params = jax.random.normal(key, (4 ** n_qubits,), dtype=jnp.float32)

    M = tetra_povm()                                  # (4, 2, 2)
    ops_all = build_operators(M, n_qubits)            # (64, 8, 8)
    P_idxs = np.arange(0, K ** n_qubits, 2)           # subset of outcomes (32)
    ops_sel = jnp.asarray(ops_all[P_idxs], dtype=jnp.complex64)

    for mm in ("chol_h", "chol"):
        p_out = snn_forward(params, ops_sel, n_qubits=n_qubits, map_method=mm)
        p_out = jax.block_until_ready(p_out)
        p_ref = reference_forward(params, ops_sel, n_qubits, map_method=mm)
        assert p_out.shape == (len(P_idxs),)
        assert jnp.allclose(p_out, p_ref, atol=1e-5, rtol=1e-4), (mm, p_out, p_ref)

    print("KERNEL_OK")
</pallas_src>

<mosaic_0001>
module attributes {stable_mosaic.version = 11 : i64} {
  func.func @_rho_kernel(%arg0: memref<8x8xf32, #tpu.memory_space<vmem>>, %arg1: memref<8x8xf32, #tpu.memory_space<vmem>>, %arg2: memref<8x8xf32, #tpu.memory_space<vmem>>, %arg3: memref<8x8xf32, #tpu.memory_space<vmem>>) attributes {dimension_semantics = [], scalar_prefetch = 0 : i64, scratch_operands = 0 : i64, tpu.core_type = #tpu.core_type<tc>} {
    %c0 = arith.constant 0 : index
    %c0_0 = arith.constant 0 : index
    %0 = vector.load %arg0[%c0, %c0_0] : memref<8x8xf32, #tpu.memory_space<vmem>>, vector<8x8xf32>
    %c0_1 = arith.constant 0 : index
    %c0_2 = arith.constant 0 : index
    %1 = vector.load %arg1[%c0_1, %c0_2] : memref<8x8xf32, #tpu.memory_space<vmem>>, vector<8x8xf32>
    %2 = tpu.iota {dimensions = array<i32: 0>} : vector<8x8xi32>
    %3 = tpu.iota {dimensions = array<i32: 1>} : vector<8x8xi32>
    %cst = arith.constant 0.000000e+00 : f32
    %4 = vector.broadcast %cst : f32 to vector<8x8xf32>
    %5 = arith.cmpi sge, %2, %3 : vector<8x8xi32>
    %6 = arith.select %5, %0, %1 : vector<8x8xi1>, vector<8x8xf32>
    %7 = arith.cmpi sgt, %2, %3 : vector<8x8xi32>
    %8 = arith.cmpi slt, %2, %3 : vector<8x8xi32>
    %cst_3 = arith.constant 0.000000e+00 : f32
    %9 = vector.broadcast %cst_3 : f32 to vector<8x8xf32>
    %10 = arith.subf %9, %0 : vector<8x8xf32>
    %11 = arith.select %8, %10, %4 : vector<8x8xi1>, vector<8x8xf32>
    %12 = arith.select %7, %1, %11 : vector<8x8xi1>, vector<8x8xf32>
    %cst_4 = arith.constant 0.000000e+00 : f32
    %13 = vector.broadcast %cst_4 : f32 to vector<8x8xf32>
    %14 = arith.subf %13, %12 : vector<8x8xf32>
    %15 = arith.mulf %6, %6 : vector<8x8xf32>
    %16 = arith.mulf %12, %12 : vector<8x8xf32>
    %17 = arith.addf %15, %16 : vector<8x8xf32>
    %18 = vector.shape_cast %17 : vector<8x8xf32> to vector<1x8x8xf32>
    %cst_5 = arith.constant dense<0.000000e+00> : vector<1xf32>
    %19 = vector.multi_reduction <add>, %18, %cst_5 [1, 2] : vector<1x8x8xf32> to vector<1xf32>
    %20 = vector.shape_cast %19 : vector<1xf32> to vector<1x1x1xf32>
    %21 = vector.extract %20[0, 0, 0] : f32 from vector<1x1x1xf32>
    %cst_6 = arith.constant 1.000000e+00 : f32
    %22 = arith.divf %cst_6, %21 : f32
    %cst_7 = arith.constant dense<0.000000e+00> : vector<8x8xf32>
    %23 = tpu.matmul %6, %6, %cst_7 {dimension_numbers = #tpu.dot_dimension_numbers<[1], [0], [0], [1], [0, 0, 1, 1], [], []>} : vector<8x8xf32>, vector<8x8xf32>, vector<8x8xf32> -> vector<8x8xf32>
    %cst_8 = arith.constant dense<0.000000e+00> : vector<8x8xf32>
    %24 = tpu.matmul %14, %12, %cst_8 {dimension_numbers = #tpu.dot_dimension_numbers<[1], [0], [0], [1], [0, 0, 1, 1], [], []>} : vector<8x8xf32>, vector<8x8xf32>, vector<8x8xf32> -> vector<8x8xf32>
    %25 = arith.addf %23, %24 : vector<8x8xf32>
    %cst_9 = arith.constant dense<0.000000e+00> : vector<8x8xf32>
    %26 = tpu.matmul %6, %12, %cst_9 {dimension_numbers = #tpu.dot_dimension_numbers<[1], [0], [0], [1], [0, 0, 1, 1], [], []>} : vector<8x8xf32>, vector<8x8xf32>, vector<8x8xf32> -> vector<8x8xf32>
    %cst_10 = arith.constant dense<0.000000e+00> : vector<8x8xf32>
    %27 = tpu.matmul %14, %6, %cst_10 {dimension_numbers = #tpu.dot_dimension_numbers<[1], [0], [0], [1], [0, 0, 1, 1], [], []>} : vector<8x8xf32>, vector<8x8xf32>, vector<8x8xf32> -> vector<8x8xf32>
    %28 = arith.subf %26, %27 : vector<8x8xf32>
    %29 = vector.broadcast %22 : f32 to vector<8x8xf32>
    %30 = arith.mulf %25, %29 : vector<8x8xf32>
    %c0_11 = arith.constant 0 : index
    %c0_12 = arith.constant 0 : index
    %31 = vector.load %arg2[%c0_11, %c0_12] : memref<8x8xf32, #tpu.memory_space<vmem>>, vector<8x8xf32>
    tpu.vector_store %arg2[%c0_11, %c0_12], %30 {strides = array<i32>} : memref<8x8xf32, #tpu.memory_space<vmem>>, vector<8x8xf32>,
    %32 = vector.broadcast %22 : f32 to vector<8x8xf32>
    %33 = arith.mulf %28, %32 : vector<8x8xf32>
    %c0_13 = arith.constant 0 : index
    %c0_14 = arith.constant 0 : index
    %34 = vector.load %arg3[%c0_13, %c0_14] : memref<8x8xf32, #tpu.memory_space<vmem>>, vector<8x8xf32>
    tpu.vector_store %arg3[%c0_13, %c0_14], %33 {strides = array<i32>} : memref<8x8xf32, #tpu.memory_space<vmem>>, vector<8x8xf32>,
    return
  }
}

</mosaic_0001>

<bundles_post_ra>
// kernel: tpu_custom_call.1
= control target key start
LH: loop header
LB: loop body
LE: loop exit
PB: predicated region body
PF: predicated region fallthrough
CT: control target
= control target key end

     0   :  { %9 = vsyncpa [#allocation3], 0  ;;  %s573_s0 = inlined_call_operand.hbm [shape: f32[8,8], index: 0, kind: input, shape index: {}]   ;;  %s574_s1 = inlined_call_operand.hbm [shape: f32[8,8], index: 1, kind: input, shape index: {}]   ;;  %s575_s2 = inlined_call_operand.hbm [shape: f32[8,8], index: 2, kind: output, shape index: {0}]   ;;  %s576_s3 = inlined_call_operand.hbm [shape: f32[8,8], index: 3, kind: output, shape index: {1}]  }
   0x1   :  { %10 = vsyncpa [#allocation6], 0 }
   0x2   :  { %11 = vsyncpa [#allocation4], 0 }
   0x3   :  { %12 = vsyncpa [#allocation9], 0  ;;  %s524_s12 = smov [#allocation2]   ;;  %s525_s14 = smov [#allocation5]  }
   0x4   :  { %s19_s13 = sshll.u32 %s524_s12, 4  ;;  %s29_s15 = sshll.u32 %s525_s14, 4  ;;  %s20_s13 = int_to_ptr.vmem [resolvable:$true] %s19_s13  ;;  %s30_s15 = int_to_ptr.vmem [resolvable:$true] %s29_s15 }
   0x5   :  { %s444_s16 = scalar_lea.vmem %s20_s13, 128  ;;  %p449_p1 = scmp.lt.s32.totalorder %s20_s13, %s20_s13 }
   0x6   :  { %p445_p0 = scmp.ne.s32.totalorder %s20_s13, %s444_s16  ;;  %p450_p2 = scmp.lt.s32.totalorder %s444_s16, %s444_s16 }
   0x8   :  { %p451_p3 = por %p450_p2, %p449_p1 }
   0xa   :  { %p452_p4 = pnand %p451_p3, %p445_p0 }
   0xc   :  { %455 = shalt.err (!%p452_p4)
}
   0xd   :  { %22 = dma.hbm_to_vmem [thread:$0]  %s573_s0, 128, %s20_s13, [#allocation3]  }
   0xe   :  { %s464_s19 = scalar_lea.vmem %s30_s15, 128  ;;  %p469_p6 = scmp.lt.s32.totalorder %s30_s15, %s30_s15 }
   0xf   :  { %p465_p5 = scmp.ne.s32.totalorder %s30_s15, %s464_s19  ;;  %p470_p7 = scmp.lt.s32.totalorder %s464_s19, %s464_s19 }
  0x11   :  { %p471_p8 = por %p470_p7, %p469_p6 }
  0x13   :  { %p472_p9 = pnand %p471_p8, %p465_p5 }
  0x15   :  { %475 = shalt.err (!%p472_p9)
}
  0x16   :  { %32 = dma.hbm_to_vmem [thread:$0]  %s574_s1, 128, %s30_s15, [#allocation6]  }
  0x17   :  { %516 = dma.done.wait [#allocation3], 128  }
  0x18   :  { %517 = vsyncadd [#allocation3], 4294967168 }
  0x19   :  { %518 = dma.done.wait [#allocation6], 128  }
  0x1a   :  { %519 = vsyncadd [#allocation6], 4294967168  ;;  %v41_v0 = vlaneseq  ;;  %v526_v1 = vmov 0.0   ;;  %vm527_vm0 = vmmov 0   ;;  %v39_v4 = vld [vmem:[#allocation2] sm:$0xff]  ;;  %v40_v5 = vld [vmem:[#allocation5] sm:$0xff] }
  0x1b   :  { %404 = vmatprep.subr.mxu0 %v526_v1  ;;  %409 = vmatprep.subr.mxu1 %v526_v1  ;;  %v49_v7 = vsub.f32 0.0, %v39_v4  ;;  %vm56_vm4 = vcmask 64512   ;;  %s528_s1 = smov [#allocation7]   ;;  %s529_s24 = smov [#allocation8]  }
  0x1c   :  { %v42_v2 = vshrl.u32 %v41_v0, 7  ;;  %v44_v3 = vand.u32 127, %v41_v0  ;;  %406 = vmatprep.mubr.msk.f32.mxu0 %vm527_vm0, %v526_v1  ;;  %411 = vmatprep.mubr.msk.f32.mxu1 %vm527_vm0, %v526_v1  ;;  %s368_s22 = sshll.u32 %s528_s1, 4  ;;  %s378_s25 = sshll.u32 %s529_s24, 4  ;;  %s369_s22 = int_to_ptr.vmem [resolvable:$true] %s368_s22  ;;  %s379_s25 = int_to_ptr.vmem [resolvable:$true] %s378_s25 }
  0x1d   :  { %s476_s26 = scalar_lea.vmem %s369_s22, 128  ;;  %p481_p11 = scmp.lt.s32.totalorder %s369_s22, %s369_s22 }
  0x1e   :  { %vm45_vm1 = vcmp.ge.s32.totalorder %v42_v2, %v44_v3  ;;  %vm48_vm2 = vcmp.lt.s32.totalorder %v42_v2, %v44_v3  ;;  %vm47_vm3 = vcmp.gt.s32.totalorder %v42_v2, %v44_v3  ;;  %p477_p10 = scmp.ne.s32.totalorder %s369_s22, %s476_s26  ;;  %p482_p12 = scmp.lt.s32.totalorder %s476_s26, %s476_s26 }
  0x1f   :  { %v46_v6 = vsel %vm45_vm1, %v39_v4, %v40_v5  ;;  %v50_v8 = vsel %vm48_vm2, %v49_v7, 0.0 }
  0x20   :  { %410 = vmatpush3.msra.mxu1 %v46_v6  ;;  %v53_v9 = vmul.f32 %v46_v6, %v46_v6  ;;  %v51_v10 = vsel %vm47_vm3, %v40_v5, %v50_v8  ;;  %p483_p13 = por %p482_p12, %p481_p11 }
  0x21   :  { %412 = vmatmul.mubr.msk.f32.vlgmr.msra.gmra.mxu1 %vm56_vm4, %v46_v6  ;;  %419 = vmatprep.subr.mxu1 %v526_v1  ;;  %v54_v11 = vmul.f32 %v51_v10, %v51_v10  ;;  %v52_v12 = vsub.f32 0.0, %v51_v10 }
  0x22   :  { %420 = vmatpush3.msra.mxu1 %v46_v6  ;;  %421 = vmatprep.mubr.msk.f32.mxu1 %vm527_vm0, %v526_v1  ;;  %p484_p0 = pnand %p483_p13, %p477_p10 }
  0x23   :  { %405 = vmatpush3.msra.mxu0 %v51_v10  ;;  %v55_v13 = vadd.f32 %v54_v11, %v53_v9 }
  0x24   :  { %414 = vmatprep.subr.mxu0 %v526_v1  ;;  %407 = vmatmul.mubr.msk.f32.vlgmr.msra.gmra.mxu0 %vm56_vm4, %v52_v12 }
  0x25   :  { %422 = vmatmul.mubr.msk.f32.vlgmr.msra.gmra.mxu1 %vm56_vm4, %v52_v12  ;;  %415 = vmatpush3.msra.mxu0 %v51_v10  ;;  %v57_v14 = vsel %vm56_vm4, %v55_v13, 0.0 }
  0x26   :  { %416 = vmatprep.mubr.msk.f32.mxu0 %vm527_vm0, %v526_v1  ;;  %58 = vadd.xlane.f32.xlu0 %v57_v14 }
  0x28   :  { %417 = vmatmul.mubr.msk.f32.vlgmr.msra.gmra.mxu0 %vm56_vm4, %v46_v6 }
  0xaf   :  { %v59_v15 = vpop.xlane.xlu0 %58 }
  0xb0   :  { %v60_v16 = vrot.slane %v59_v15, 4 }
  0xb2   :  { %v61_v17 = vadd.f32 %v60_v16, %v59_v15 }
  0xb4   :  { %v62_v18 = vrot.slane %v61_v17, 2 }
  0xb6   :  { %v63_v19 = vadd.f32 %v62_v18, %v61_v17 }
  0xb8   :  { %v64_v20 = vrot.slane %v63_v19, 1 }
  0xba   :  { %v65_v21 = vadd.f32 %v64_v20, %v63_v19 }
  0xbc   :  { %424 = vpush %v65_v21 }
  0xe1   :  { %v212_v22 = vpop.f32.mrf.mxu1 }
  0xe3   :  { %v413_v23 = vpop.f32.mrf.mxu1 }
  0xe4   :  { %v139_v24 = vpop.f32.mrf.mxu0 }
  0xe5   :  { %v352_v25 = vpop.f32.mrf.mxu1  ;;  %v213_v26 = vadd.f32 %v212_v22, %v139_v24 }
  0xe6   :  { %v408_v27 = vpop.f32.mrf.mxu0 }
  0xe7   :  { %v423_v28 = vpop.f32.mrf.mxu1 }
  0xe8   :  { %v282_v29 = vpop.f32.mrf.mxu0 }
  0xe9   :  { %v356_v30 = vsub.f32 %v282_v29, %v352_v25 }
  0xea   :  { %v418_v31 = vpop.f32.mrf.mxu0 }
  0xed   :  { %s425_s0 = spop %424 }
  0xee   :  { %v67_v32 = vstv %s425_s0 }
  0xef   :  { %434 = vrcp.f32 %v67_v32 }
  0xfc   :  { %v435_v33 = vpop.eup %434 }
  0xfd   :  { %426 = vpush %v435_v33 }
 0x12e   :  { %s427_s23 = spop %426 }
 0x12f   :  { %v357_v34 = vstv %s427_s23 }
 0x130   :  { %v358_v35 = vmul.f32 %v357_v34, %v213_v26  ;;  %v360_v36 = vmul.f32 %v357_v34, %v356_v30 }
 0x132   :  { %359 = vst.msk [vmem:[#allocation7] sm:$0xff] %vm56_vm4, %v358_v35  ;;  %361 = vst.msk [vmem:[#allocation8] sm:$0xff] %vm56_vm4, %v360_v36 }
 0x133   :  { %487 = shalt.err (!%p484_p0)
}
 0x134   :  { %371 = dma.vmem_to_hbm [thread:$0]  %s369_s22, 128, %s575_s2, [#allocation4]  }
 0x135   :  { %s496_s29 = scalar_lea.vmem %s379_s25, 128  ;;  %p501_p2 = scmp.lt.s32.totalorder %s379_s25, %s379_s25 }
 0x136   :  { %p497_p1 = scmp.ne.s32.totalorder %s379_s25, %s496_s29  ;;  %p502_p3 = scmp.lt.s32.totalorder %s496_s29, %s496_s29 }
 0x138   :  { %p503_p4 = por %p502_p3, %p501_p2 }
 0x13a   :  { %p504_p5 = pnand %p503_p4, %p497_p1 }
 0x13c   :  { %507 = shalt.err (!%p504_p5)
}
 0x13d   :  { %381 = dma.vmem_to_hbm [thread:$0]  %s379_s25, 128, %s576_s3, [#allocation9]  }
 0x13e   :  { %520 = dma.done.wait [#allocation4], 128  }
 0x13f   :  { %521 = vsyncadd [#allocation4], 4294967168 }
 0x140   :  { %522 = dma.done.wait [#allocation9], 128  }
 0x141   :  { %523 = vsyncadd [#allocation9], 4294967168 }
 0x142   :  { %388 = vsyncpa [#allocation3], 1 }
 0x143   :  { %389 = vsyncpa [#allocation6], 1 }
 0x144   :  { %390 = vsyncpa [#allocation4], 1 }
 0x145   :  { %391 = vsyncpa [#allocation9], 1 }

</bundles_post_ra>
